<compile_context>
chip_gen: v7x
topology: tpu7x:2x2x1
jax: 0.10.0
libtpu: 0.0.40
codegen_flags: <defaults>
</compile_context>

<pallas_src>
import functools
import math

import numpy as np
import jax
import jax.numpy as jnp
from jax.experimental import pallas as pl
from jax.experimental.pallas import tpu as pltpu


def _round_up(x, m):
    return (x + m - 1) // m * m


def _mha_map_kernel(q_ref, k_ref, wqt_ref, bq_ref, wk_ref, bk_ref, bias_ref,
                    out_ref, kp_ref, qp_ref, mh_ref,
                    *, num_heads, head_dim, hw_pad, mxu_dtype):
    """One (batch element, query tile) grid step.

    Block shapes:
      q_ref    : (1, tq, D)
      k_ref    : (1, D, HWp)      spatial flattened + lane-padded
      wqt_ref  : (D, hidden)      q_linear weight, pre-transposed, nf folded in
      bq_ref   : (1, hidden)      q_linear bias (f32, nf folded in)
      wk_ref   : (hidden, D)      k_linear weight (1x1 conv)
      bk_ref   : (hidden, 1)      k_linear bias (f32)
      bias_ref : (1, 1, HWp)      additive mask bias: 0 or -inf (f32)
      out_ref  : (1, tq, num_heads*HWp)
    Scratch:
      kp_ref   : (hidden, HWp)    k-projection, carried across query tiles
      qp_ref   : (tq, hidden)     q-projection for this tile
      mh_ref   : (tq, num_heads)  per-head running-max snapshots (f32)
    """
    f32 = jnp.float32
    tq = q_ref.shape[1]

    # k projection is invariant across query tiles: compute once per batch
    # element (query-tile grid axis is "arbitrary" so this scratch carries).
    @pl.when(pl.program_id(1) == 0)
    def _():
        kp = jnp.dot(wk_ref[...], k_ref[0].astype(mxu_dtype),
                     preferred_element_type=f32) + bk_ref[...]
        kp_ref[...] = kp.astype(mxu_dtype)

    # q projection for this query tile (normalize_fact pre-folded into wqt/bq).
    qp = jnp.dot(q_ref[0].astype(mxu_dtype), wqt_ref[...],
                 preferred_element_type=f32) + bq_ref[...]
    qp_ref[...] = qp.astype(mxu_dtype)

    bias = bias_ref[0]                                   # (1, HWp), 0 / -inf

    # ---- pass 1: per-head logits -> exp(x - m_run) written straight into
    # lane-aligned output slices; flash-style running max / sum (all f32).
    m_run = jnp.full((tq, 1), -jnp.inf, f32)
    l_run = jnp.zeros((tq, 1), f32)
    for n in range(num_heads):
        qh = qp_ref[:, n * head_dim:(n + 1) * head_dim]            # (tq, hd)
        kh = kp_ref[n * head_dim:(n + 1) * head_dim, :]            # (hd, HWp)
        logits = jnp.dot(qh, kh, preferred_element_type=f32) + bias
        m_new = jnp.maximum(m_run, jnp.max(logits, axis=-1, keepdims=True))
        p = jnp.exp(logits - m_new)                                # (tq, HWp)
        l_run = jnp.exp(m_run - m_new) * l_run + jnp.sum(p, axis=-1, keepdims=True)
        m_run = m_new
        mh_ref[:, n:n + 1] = m_new                                 # snapshot
        out_ref[0, :, n * hw_pad:(n + 1) * hw_pad] = p.astype(out_ref.dtype)

    # ---- pass 2: one per-head normalization pass over the output block.
    inv_l = pl.reciprocal(l_run, approx=False)           # exact; tiny (tq, 1)
    scales = jnp.exp(mh_ref[...] - m_run) * inv_l        # (tq, num_heads)
    for n in range(num_heads):
        sl = slice(n * hw_pad, (n + 1) * hw_pad)
        x = out_ref[0, :, sl].astype(f32)
        out_ref[0, :, sl] = (x * scales[:, n:n + 1]).astype(out_ref.dtype)
    # dropout(p=0) -> identity.


def mh_attention_map(q, k, wq, bq, wk, bk, mask=None, *, num_heads,
                     out_dtype=jnp.float32, mxu_dtype=None):
    """JAX/Pallas equivalent of MHAttentionMap.forward (returns softmax attention map).

    out_dtype  : output dtype (default f32 == PyTorch contract; bf16 halves writeback).
    mxu_dtype  : matmul operand dtype (default = input dtype). Accumulation and all
                 softmax math are always f32.
    """
    B, Q, D = q.shape
    Bk, Dk, H, W = k.shape
    assert Bk == B and Dk == D
    if not (q.dtype == k.dtype == wq.dtype == wk.dtype):
        raise ValueError(
            f"q/k/wq/wk must share one dtype, got {q.dtype}, {k.dtype}, {wq.dtype}, {wk.dtype}")
    hidden = wq.shape[0]
    assert hidden % num_heads == 0
    head_dim = hidden // num_heads
    HW = H * W
    HWp = HW if HW % 128 == 0 else _round_up(HW, 128)   # lane-align spatial axis
    nf = float(hidden / num_heads) ** (-0.5)
    f32 = jnp.float32
    if mxu_dtype is None:
        mxu_dtype = q.dtype

    # Grid-invariant prep: fold normalize_fact into the q projection, pre-transpose
    # Wq (no in-kernel transpose), keep biases in f32 for the post-matmul adds.
    wqt = (wq.astype(f32) * nf).astype(mxu_dtype).T              # (D, hidden)
    bq2 = (bq.astype(f32) * nf).reshape(1, hidden)
    wk2 = wk.astype(mxu_dtype)
    bk2 = bk.astype(f32).reshape(hidden, 1)

    # Flatten + lane-pad k's spatial axis (skipped entirely when HW % 128 == 0).
    k2 = k.reshape(B, D, HW)
    if HWp > HW:
        k2 = jnp.pad(k2, ((0, 0), (0, 0), (0, HWp - HW)))

    # Additive mask bias precomputed once (0 / -inf). Padded columns are forced to
    # -inf so the softmax denominator is unchanged; they are sliced off below.
    if mask is None:
        bias = jnp.zeros((B, HW), f32)
    else:
        bias = jnp.where(mask.reshape(B, HW).astype(bool),
                         -jnp.inf, 0.0).astype(f32)
    if HWp > HW:
        bias = jnp.pad(bias, ((0, 0), (0, HWp - HW)), constant_values=-jnp.inf)
    bias = bias.reshape(B, 1, HWp)

    # Query tiling: up to 128 rows per tile (fills MXU rows); 16-row granularity
    # for 2-byte operands (sublane packing), 8 for f32.
    qgran = 8 * (4 // np.dtype(mxu_dtype).itemsize)
    tq = min(_round_up(Q, qgran), 128)
    Qp = _round_up(Q, tq)
    qpad = q if Qp == Q else jnp.pad(q, ((0, 0), (0, Qp - Q), (0, 0)))

    # VMEM budget per generation: 128 MiB parts (v5e/v6e) -> 96 MiB, v7x (64 MiB) -> 48 MiB.
    try:
        cap = int(pltpu.get_tpu_info().vmem_capacity_bytes)
    except Exception:
        cap = 64 * 1024 * 1024
    vmem_limit = min(96 * 1024 * 1024, (cap * 3) // 4)

    kernel = functools.partial(
        _mha_map_kernel, num_heads=num_heads, head_dim=head_dim,
        hw_pad=HWp, mxu_dtype=mxu_dtype)

    out = pl.pallas_call(
        kernel,
        out_shape=jax.ShapeDtypeStruct((B, Qp, num_heads * HWp), out_dtype),
        grid_spec=pltpu.PrefetchScalarGridSpec(
            num_scalar_prefetch=0,
            # Batch axis is "parallel" (feeds both TCs on v7x when B >= 2); the
            # query-tile axis must be "arbitrary" because kp scratch carries across it.
            grid=(B, Qp // tq),
            in_specs=[
                pl.BlockSpec((1, tq, D), lambda bi, qi: (bi, qi, 0)),   # q
                pl.BlockSpec((1, D, HWp), lambda bi, qi: (bi, 0, 0)),   # k (flattened)
                pl.BlockSpec((D, hidden), lambda bi, qi: (0, 0)),       # Wq^T (scaled)
                pl.BlockSpec((1, hidden), lambda bi, qi: (0, 0)),       # bq (scaled, f32)
                pl.BlockSpec((hidden, D), lambda bi, qi: (0, 0)),       # Wk
                pl.BlockSpec((hidden, 1), lambda bi, qi: (0, 0)),       # bk (f32)
                pl.BlockSpec((1, 1, HWp), lambda bi, qi: (bi, 0, 0)),   # mask bias
            ],
            out_specs=pl.BlockSpec((1, tq, num_heads * HWp),
                                   lambda bi, qi: (bi, qi, 0)),
            scratch_shapes=[
                pltpu.VMEM((hidden, HWp), mxu_dtype),      # kp (carried over query tiles)
                pltpu.VMEM((tq, hidden), mxu_dtype),       # qp
                pltpu.VMEM((tq, num_heads), jnp.float32),  # per-head max snapshots
            ]),
        compiler_params=pltpu.CompilerParams(
            dimension_semantics=("parallel", "arbitrary"),
            vmem_limit_bytes=vmem_limit,
        ),
    )(qpad, k2, wqt, bq2, wk2, bk2, bias)

    # Free reshape; the slice (a copy) only happens when padding was added.
    out = out.reshape(B, Qp, num_heads, HWp)
    if Qp != Q or HWp != HW:
        out = out[:, :Q, :, :HW]
    return out.reshape(B, Q, num_heads, H, W)


def _reference(q, k, wq, bq, wk, bk, mask, num_heads):
    # Pure-JAX mirror of the PyTorch forward, for validation.
    B, Q, D = q.shape
    hidden = wq.shape[0]
    hd = hidden // num_heads
    H, W = k.shape[-2:]
    nf = float(hidden / num_heads) ** (-0.5)
    qp = q @ wq.T + bq
    kp = jnp.einsum('od,bdhw->bohw', wk, k) + bk[None, :, None, None]
    qh = qp.reshape(B, Q, num_heads, hd)
    kh = kp.reshape(B, num_heads, hd, H, W)
    w = jnp.einsum('bqnc,bnchw->bqnhw', qh * nf, kh)
    if mask is not None:
        w = jnp.where(mask[:, None, None, :, :], -jnp.inf, w)
    flat = jax.nn.softmax(w.reshape(B, Q, -1), axis=-1)
    return flat.reshape(B, Q, num_heads, H, W)


if __name__ == "__main__":
    # Small, deterministic configuration.
    B, Q, query_dim = 2, 8, 32
    hidden_dim, num_heads = 32, 4
    H = W = 8

    key = jax.random.PRNGKey(0)
    k_q, k_k, k_wq, k_wk, k_m = jax.random.split(key, 5)

    q = jax.random.normal(k_q, (B, Q, query_dim), jnp.float32)
    k = jax.random.normal(k_k, (B, query_dim, H, W), jnp.float32)   # NCHW

    # xavier_uniform-style deterministic init, zero biases (as in module __init__).
    bound = math.sqrt(6.0 / (query_dim + hidden_dim))
    wq = jax.random.uniform(k_wq, (hidden_dim, query_dim), jnp.float32, -bound, bound)
    wk = jax.random.uniform(k_wk, (hidden_dim, query_dim), jnp.float32, -bound, bound)
    bq = jnp.zeros((hidden_dim,), jnp.float32)
    bk = jnp.zeros((hidden_dim,), jnp.float32)

    mask = jax.random.uniform(k_m, (B, H, W)) > 0.8   # True = masked (-inf)

    # f32 path: compare against the pure-JAX reference.
    out = jax.block_until_ready(
        mh_attention_map(q, k, wq, bq, wk, bk, mask, num_heads=num_heads))
    ref = _reference(q, k, wq, bq, wk, bk, mask, num_heads)
    assert out.shape == (B, Q, num_heads, H, W)
    assert bool(jnp.allclose(out, ref, atol=2e-3, rtol=2e-3)), "f32 mismatch vs reference"
    assert bool(jnp.allclose(out.reshape(B, Q, -1).sum(-1), 1.0, atol=2e-3)), \
        "softmax rows do not sum to 1"

    # bf16 I/O smoke test: bf16 MXU operands + bf16 output, f32 softmax math inside.
    bf = jnp.bfloat16
    out_bf = jax.block_until_ready(mh_attention_map(
        q.astype(bf), k.astype(bf), wq.astype(bf), bq.astype(bf),
        wk.astype(bf), bk.astype(bf), mask, num_heads=num_heads, out_dtype=bf))
    assert out_bf.shape == (B, Q, num_heads, H, W)
    assert out_bf.dtype == bf
    assert bool(jnp.all(jnp.isfinite(out_bf.astype(jnp.float32))))
    assert bool(jnp.allclose(out_bf.astype(jnp.float32).reshape(B, Q, -1).sum(-1),
                             1.0, atol=2e-2))

    print("KERNEL_OK")
</pallas_src>

<mosaic_0001>
module attributes {stable_mosaic.version = 11 : i64} {
  func.func @_mha_map_kernel(%arg0: i32, %arg1: i32, %arg2: memref<1x8x32xf32, #tpu.memory_space<vmem>>, %arg3: memref<1x32x128xf32, #tpu.memory_space<vmem>>, %arg4: memref<32x32xf32, #tpu.memory_space<vmem>>, %arg5: memref<1x32xf32, #tpu.memory_space<vmem>>, %arg6: memref<32x32xf32, #tpu.memory_space<vmem>>, %arg7: memref<32x1xf32, #tpu.memory_space<vmem>>, %arg8: memref<1x1x128xf32, #tpu.memory_space<vmem>>, %arg9: memref<1x8x512xf32, #tpu.memory_space<vmem>>, %arg10: memref<32x128xf32, #tpu.memory_space<vmem>>, %arg11: memref<8x32xf32, #tpu.memory_space<vmem>>, %arg12: memref<8x4xf32, #tpu.memory_space<vmem>>) attributes {dimension_semantics = [#tpu.dimension_semantics<parallel>, #tpu.dimension_semantics<arbitrary>], iteration_bounds = array<i64: 2, 1>, scalar_prefetch = 0 : i64, scratch_operands = 3 : i64, tpu.core_type = #tpu.core_type<tc>, window_params = [{transform_indices = @transform_0, window_bounds = array<i64: 1, 8, 32>}, {transform_indices = @transform_1, window_bounds = array<i64: 1, 32, 128>}, {pipeline_mode = #tpu.pipeline_mode<synchronous>, transform_indices = @transform_2, window_bounds = array<i64: 32, 32>}, {pipeline_mode = #tpu.pipeline_mode<synchronous>, transform_indices = @transform_3, window_bounds = array<i64: 1, 32>}, {pipeline_mode = #tpu.pipeline_mode<synchronous>, transform_indices = @transform_4, window_bounds = array<i64: 32, 32>}, {pipeline_mode = #tpu.pipeline_mode<synchronous>, transform_indices = @transform_5, window_bounds = array<i64: 32, 1>}, {transform_indices = @transform_6, window_bounds = array<i64: 1, 1, 128>}, {transform_indices = @transform_7, window_bounds = array<i64: 1, 8, 512>}]} {
    %c0_i32 = arith.constant 0 : i32
    %0 = arith.cmpi eq, %arg1, %c0_i32 : i32
    %1 = arith.extui %0 : i1 to i32
    %c0_i32_0 = arith.constant 0 : i32
    %2 = arith.cmpi ne, %1, %c0_i32_0 : i32
    scf.if %2 {
      %c0_79 = arith.constant 0 : index
      %c0_80 = arith.constant 0 : index
      %138 = vector.load %arg6[%c0_79, %c0_80] : memref<32x32xf32, #tpu.memory_space<vmem>>, vector<32x32xf32>
      %c0_81 = arith.constant 0 : index
      %c0_82 = arith.constant 0 : index
      %c0_83 = arith.constant 0 : index
      %139 = vector.load %arg3[%c0_81, %c0_82, %c0_83] : memref<1x32x128xf32, #tpu.memory_space<vmem>>, vector<1x32x128xf32>
      %140 = vector.shape_cast %139 : vector<1x32x128xf32> to vector<32x128xf32>
      %cst_84 = arith.constant dense<0.000000e+00> : vector<32x128xf32>
      %141 = tpu.matmul %138, %140, %cst_84 {dimension_numbers = #tpu.dot_dimension_numbers<[1], [0], [0], [1], [0, 0, 1, 1], [], []>} : vector<32x32xf32>, vector<32x128xf32>, vector<32x128xf32> -> vector<32x128xf32>
      %c0_85 = arith.constant 0 : index
      %c0_86 = arith.constant 0 : index
      %142 = vector.load %arg7[%c0_85, %c0_86] : memref<32x1xf32, #tpu.memory_space<vmem>>, vector<32x1xf32>
      %143 = vector.broadcast %142 : vector<32x1xf32> to vector<32x128xf32>
      %144 = arith.addf %141, %143 : vector<32x128xf32>
      %c0_87 = arith.constant 0 : index
      %c0_88 = arith.constant 0 : index
      %145 = vector.load %arg10[%c0_87, %c0_88] : memref<32x128xf32, #tpu.memory_space<vmem>>, vector<32x128xf32>
      tpu.vector_store %arg10[%c0_87, %c0_88], %144 {strides = array<i32>} : memref<32x128xf32, #tpu.memory_space<vmem>>, vector<32x128xf32>,
    } else {
    }
    %c0 = arith.constant 0 : index
    %c0_1 = arith.constant 0 : index
    %c0_2 = arith.constant 0 : index
    %3 = vector.load %arg2[%c0, %c0_1, %c0_2] : memref<1x8x32xf32, #tpu.memory_space<vmem>>, vector<1x8x32xf32>
    %4 = vector.shape_cast %3 : vector<1x8x32xf32> to vector<8x32xf32>
    %c0_3 = arith.constant 0 : index
    %c0_4 = arith.constant 0 : index
    %5 = vector.load %arg4[%c0_3, %c0_4] : memref<32x32xf32, #tpu.memory_space<vmem>>, vector<32x32xf32>
    %cst = arith.constant dense<0.000000e+00> : vector<8x32xf32>
    %6 = tpu.matmul %4, %5, %cst {dimension_numbers = #tpu.dot_dimension_numbers<[1], [0], [0], [1], [0, 0, 1, 1], [], []>} : vector<8x32xf32>, vector<32x32xf32>, vector<8x32xf32> -> vector<8x32xf32>
    %c0_5 = arith.constant 0 : index
    %c0_6 = arith.constant 0 : index
    %7 = vector.load %arg5[%c0_5, %c0_6] : memref<1x32xf32, #tpu.memory_space<vmem>>, vector<1x32xf32>
    %8 = vector.broadcast %7 : vector<1x32xf32> to vector<8x32xf32>
    %9 = arith.addf %6, %8 : vector<8x32xf32>
    %c0_7 = arith.constant 0 : index
    %c0_8 = arith.constant 0 : index
    %10 = vector.load %arg11[%c0_7, %c0_8] : memref<8x32xf32, #tpu.memory_space<vmem>>, vector<8x32xf32>
    tpu.vector_store %arg11[%c0_7, %c0_8], %9 {strides = array<i32>} : memref<8x32xf32, #tpu.memory_space<vmem>>, vector<8x32xf32>,
    %c0_9 = arith.constant 0 : index
    %c0_10 = arith.constant 0 : index
    %c0_11 = arith.constant 0 : index
    %11 = vector.load %arg8[%c0_9, %c0_10, %c0_11] : memref<1x1x128xf32, #tpu.memory_space<vmem>>, vector<1x1x128xf32>
    %12 = vector.shape_cast %11 : vector<1x1x128xf32> to vector<1x128xf32>
    %cst_12 = arith.constant 0xFF800000 : f32
    %13 = vector.broadcast %cst_12 : f32 to vector<8x1xf32>
    %cst_13 = arith.constant 0.000000e+00 : f32
    %14 = vector.broadcast %cst_13 : f32 to vector<8x1xf32>
    %c0_14 = arith.constant 0 : index
    %c0_15 = arith.constant 0 : index
    %15 = vector.load %arg11[%c0_14, %c0_15] : memref<8x32xf32, #tpu.memory_space<vmem>>, vector<8x8xf32>
    %c0_16 = arith.constant 0 : index
    %c0_17 = arith.constant 0 : index
    %16 = vector.load %arg10[%c0_16, %c0_17] : memref<32x128xf32, #tpu.memory_space<vmem>>, vector<8x128xf32>
    %cst_18 = arith.constant dense<0.000000e+00> : vector<8x128xf32>
    %17 = tpu.matmul %15, %16, %cst_18 {dimension_numbers = #tpu.dot_dimension_numbers<[1], [0], [0], [1], [0, 0, 1, 1], [], []>} : vector<8x8xf32>, vector<8x128xf32>, vector<8x128xf32> -> vector<8x128xf32>
    %18 = vector.broadcast %12 : vector<1x128xf32> to vector<8x128xf32>
    %19 = arith.addf %17, %18 : vector<8x128xf32>
    %cst_19 = arith.constant dense<0xFF800000> : vector<8xf32>
    %20 = vector.multi_reduction <maximumf>, %19, %cst_19 [1] : vector<8x128xf32> to vector<8xf32>
    %21 = vector.shape_cast %20 : vector<8xf32> to vector<8x1xf32>
    %22 = arith.maximumf %13, %21 : vector<8x1xf32>
    %23 = vector.broadcast %22 : vector<8x1xf32> to vector<8x128xf32>
    %24 = arith.subf %19, %23 : vector<8x128xf32>
    %25 = math.exp %24 : vector<8x128xf32>
    %26 = arith.subf %13, %22 : vector<8x1xf32>
    %27 = math.exp %26 : vector<8x1xf32>
    %28 = arith.mulf %27, %14 : vector<8x1xf32>
    %cst_20 = arith.constant dense<0.000000e+00> : vector<8xf32>
    %29 = vector.multi_reduction <add>, %25, %cst_20 [1] : vector<8x128xf32> to vector<8xf32>
    %30 = vector.shape_cast %29 : vector<8xf32> to vector<8x1xf32>
    %31 = arith.addf %28, %30 : vector<8x1xf32>
    %c0_21 = arith.constant 0 : index
    %c0_22 = arith.constant 0 : index
    %32 = vector.load %arg12[%c0_21, %c0_22] : memref<8x4xf32, #tpu.memory_space<vmem>>, vector<8x1xf32>
    tpu.vector_store %arg12[%c0_21, %c0_22], %22 {strides = array<i32>} : memref<8x4xf32, #tpu.memory_space<vmem>>, vector<8x1xf32>,
    %c0_23 = arith.constant 0 : index
    %c0_24 = arith.constant 0 : index
    %c0_25 = arith.constant 0 : index
    %33 = vector.load %arg9[%c0_23, %c0_24, %c0_25] : memref<1x8x512xf32, #tpu.memory_space<vmem>>, vector<1x8x128xf32>
    %34 = vector.shape_cast %33 : vector<1x8x128xf32> to vector<8x128xf32>
    %35 = vector.shape_cast %25 : vector<8x128xf32> to vector<1x8x128xf32>
    tpu.vector_store %arg9[%c0_23, %c0_24, %c0_25], %35 {strides = array<i32>} : memref<1x8x512xf32, #tpu.memory_space<vmem>>, vector<1x8x128xf32>,
    %c0_26 = arith.constant 0 : index
    %c8 = arith.constant 8 : index
    %36 = vector.load %arg11[%c0_26, %c8] : memref<8x32xf32, #tpu.memory_space<vmem>>, vector<8x8xf32>
    %c8_27 = arith.constant 8 : index
    %c0_28 = arith.constant 0 : index
    %37 = vector.load %arg10[%c8_27, %c0_28] : memref<32x128xf32, #tpu.memory_space<vmem>>, vector<8x128xf32>
    %cst_29 = arith.constant dense<0.000000e+00> : vector<8x128xf32>
    %38 = tpu.matmul %36, %37, %cst_29 {dimension_numbers = #tpu.dot_dimension_numbers<[1], [0], [0], [1], [0, 0, 1, 1], [], []>} : vector<8x8xf32>, vector<8x128xf32>, vector<8x128xf32> -> vector<8x128xf32>
    %39 = vector.broadcast %12 : vector<1x128xf32> to vector<8x128xf32>
    %40 = arith.addf %38, %39 : vector<8x128xf32>
    %cst_30 = arith.constant dense<0xFF800000> : vector<8xf32>
    %41 = vector.multi_reduction <maximumf>, %40, %cst_30 [1] : vector<8x128xf32> to vector<8xf32>
    %42 = vector.shape_cast %41 : vector<8xf32> to vector<8x1xf32>
    %43 = arith.maximumf %22, %42 : vector<8x1xf32>
    %44 = vector.broadcast %43 : vector<8x1xf32> to vector<8x128xf32>
    %45 = arith.subf %40, %44 : vector<8x128xf32>
    %46 = math.exp %45 : vector<8x128xf32>
    %47 = arith.subf %22, %43 : vector<8x1xf32>
    %48 = math.exp %47 : vector<8x1xf32>
    %49 = arith.mulf %48, %31 : vector<8x1xf32>
    %cst_31 = arith.constant dense<0.000000e+00> : vector<8xf32>
    %50 = vector.multi_reduction <add>, %46, %cst_31 [1] : vector<8x128xf32> to vector<8xf32>
    %51 = vector.shape_cast %50 : vector<8xf32> to vector<8x1xf32>
    %52 = arith.addf %49, %51 : vector<8x1xf32>
    %c0_32 = arith.constant 0 : index
    %c1 = arith.constant 1 : index
    %53 = vector.load %arg12[%c0_32, %c1] : memref<8x4xf32, #tpu.memory_space<vmem>>, vector<8x1xf32>
    tpu.vector_store %arg12[%c0_32, %c1], %43 {strides = array<i32>} : memref<8x4xf32, #tpu.memory_space<vmem>>, vector<8x1xf32>,
    %c0_33 = arith.constant 0 : index
    %c0_34 = arith.constant 0 : index
    %c128 = arith.constant 128 : index
    %54 = vector.load %arg9[%c0_33, %c0_34, %c128] : memref<1x8x512xf32, #tpu.memory_space<vmem>>, vector<1x8x128xf32>
    %55 = vector.shape_cast %54 : vector<1x8x128xf32> to vector<8x128xf32>
    %56 = vector.shape_cast %46 : vector<8x128xf32> to vector<1x8x128xf32>
    tpu.vector_store %arg9[%c0_33, %c0_34, %c128], %56 {strides = array<i32>} : memref<1x8x512xf32, #tpu.memory_space<vmem>>, vector<1x8x128xf32>,
    %c0_35 = arith.constant 0 : index
    %c16 = arith.constant 16 : index
    %57 = vector.load %arg11[%c0_35, %c16] : memref<8x32xf32, #tpu.memory_space<vmem>>, vector<8x8xf32>
    %c16_36 = arith.constant 16 : index
    %c0_37 = arith.constant 0 : index
    %58 = vector.load %arg10[%c16_36, %c0_37] : memref<32x128xf32, #tpu.memory_space<vmem>>, vector<8x128xf32>
    %cst_38 = arith.constant dense<0.000000e+00> : vector<8x128xf32>
    %59 = tpu.matmul %57, %58, %cst_38 {dimension_numbers = #tpu.dot_dimension_numbers<[1], [0], [0], [1], [0, 0, 1, 1], [], []>} : vector<8x8xf32>, vector<8x128xf32>, vector<8x128xf32> -> vector<8x128xf32>
    %60 = vector.broadcast %12 : vector<1x128xf32> to vector<8x128xf32>
    %61 = arith.addf %59, %60 : vector<8x128xf32>
    %cst_39 = arith.constant dense<0xFF800000> : vector<8xf32>
    %62 = vector.multi_reduction <maximumf>, %61, %cst_39 [1] : vector<8x128xf32> to vector<8xf32>
    %63 = vector.shape_cast %62 : vector<8xf32> to vector<8x1xf32>
    %64 = arith.maximumf %43, %63 : vector<8x1xf32>
    %65 = vector.broadcast %64 : vector<8x1xf32> to vector<8x128xf32>
    %66 = arith.subf %61, %65 : vector<8x128xf32>
    %67 = math.exp %66 : vector<8x128xf32>
    %68 = arith.subf %43, %64 : vector<8x1xf32>
    %69 = math.exp %68 : vector<8x1xf32>
    %70 = arith.mulf %69, %52 : vector<8x1xf32>
    %cst_40 = arith.constant dense<0.000000e+00> : vector<8xf32>
    %71 = vector.multi_reduction <add>, %67, %cst_40 [1] : vector<8x128xf32> to vector<8xf32>
    %72 = vector.shape_cast %71 : vector<8xf32> to vector<8x1xf32>
    %73 = arith.addf %70, %72 : vector<8x1xf32>
    %c0_41 = arith.constant 0 : index
    %c2 = arith.constant 2 : index
    %74 = vector.load %arg12[%c0_41, %c2] : memref<8x4xf32, #tpu.memory_space<vmem>>, vector<8x1xf32>
    tpu.vector_store %arg12[%c0_41, %c2], %64 {strides = array<i32>} : memref<8x4xf32, #tpu.memory_space<vmem>>, vector<8x1xf32>,
    %c0_42 = arith.constant 0 : index
    %c0_43 = arith.constant 0 : index
    %c256 = arith.constant 256 : index
    %75 = vector.load %arg9[%c0_42, %c0_43, %c256] : memref<1x8x512xf32, #tpu.memory_space<vmem>>, vector<1x8x128xf32>
    %76 = vector.shape_cast %75 : vector<1x8x128xf32> to vector<8x128xf32>
    %77 = vector.shape_cast %67 : vector<8x128xf32> to vector<1x8x128xf32>
    tpu.vector_store %arg9[%c0_42, %c0_43, %c256], %77 {strides = array<i32>} : memref<1x8x512xf32, #tpu.memory_space<vmem>>, vector<1x8x128xf32>,
    %c0_44 = arith.constant 0 : index
    %c24 = arith.constant 24 : index
    %78 = vector.load %arg11[%c0_44, %c24] : memref<8x32xf32, #tpu.memory_space<vmem>>, vector<8x8xf32>
    %c24_45 = arith.constant 24 : index
    %c0_46 = arith.constant 0 : index
    %79 = vector.load %arg10[%c24_45, %c0_46] : memref<32x128xf32, #tpu.memory_space<vmem>>, vector<8x128xf32>
    %cst_47 = arith.constant dense<0.000000e+00> : vector<8x128xf32>
    %80 = tpu.matmul %78, %79, %cst_47 {dimension_numbers = #tpu.dot_dimension_numbers<[1], [0], [0], [1], [0, 0, 1, 1], [], []>} : vector<8x8xf32>, vector<8x128xf32>, vector<8x128xf32> -> vector<8x128xf32>
    %81 = vector.broadcast %12 : vector<1x128xf32> to vector<8x128xf32>
    %82 = arith.addf %80, %81 : vector<8x128xf32>
    %cst_48 = arith.constant dense<0xFF800000> : vector<8xf32>
    %83 = vector.multi_reduction <maximumf>, %82, %cst_48 [1] : vector<8x128xf32> to vector<8xf32>
    %84 = vector.shape_cast %83 : vector<8xf32> to vector<8x1xf32>
    %85 = arith.maximumf %64, %84 : vector<8x1xf32>
    %86 = vector.broadcast %85 : vector<8x1xf32> to vector<8x128xf32>
    %87 = arith.subf %82, %86 : vector<8x128xf32>
    %88 = math.exp %87 : vector<8x128xf32>
    %89 = arith.subf %64, %85 : vector<8x1xf32>
    %90 = math.exp %89 : vector<8x1xf32>
    %91 = arith.mulf %90, %73 : vector<8x1xf32>
    %cst_49 = arith.constant dense<0.000000e+00> : vector<8xf32>
    %92 = vector.multi_reduction <add>, %88, %cst_49 [1] : vector<8x128xf32> to vector<8xf32>
    %93 = vector.shape_cast %92 : vector<8xf32> to vector<8x1xf32>
    %94 = arith.addf %91, %93 : vector<8x1xf32>
    %c0_50 = arith.constant 0 : index
    %c3 = arith.constant 3 : index
    %95 = vector.load %arg12[%c0_50, %c3] : memref<8x4xf32, #tpu.memory_space<vmem>>, vector<8x1xf32>
    tpu.vector_store %arg12[%c0_50, %c3], %85 {strides = array<i32>} : memref<8x4xf32, #tpu.memory_space<vmem>>, vector<8x1xf32>,
    %c0_51 = arith.constant 0 : index
    %c0_52 = arith.constant 0 : index
    %c384 = arith.constant 384 : index
    %96 = vector.load %arg9[%c0_51, %c0_52, %c384] : memref<1x8x512xf32, #tpu.memory_space<vmem>>, vector<1x8x128xf32>
    %97 = vector.shape_cast %96 : vector<1x8x128xf32> to vector<8x128xf32>
    %98 = vector.shape_cast %88 : vector<8x128xf32> to vector<1x8x128xf32>
    tpu.vector_store %arg9[%c0_51, %c0_52, %c384], %98 {strides = array<i32>} : memref<1x8x512xf32, #tpu.memory_space<vmem>>, vector<1x8x128xf32>,
    %99 = tpu.reciprocal %94 : vector<8x1xf32> -> vector<8x1xf32>
    %c0_53 = arith.constant 0 : index
    %c0_54 = arith.constant 0 : index
    %100 = vector.load %arg12[%c0_53, %c0_54] : memref<8x4xf32, #tpu.memory_space<vmem>>, vector<8x4xf32>
    %101 = vector.broadcast %85 : vector<8x1xf32> to vector<8x4xf32>
    %102 = arith.subf %100, %101 : vector<8x4xf32>
    %103 = math.exp %102 : vector<8x4xf32>
    %104 = vector.broadcast %99 : vector<8x1xf32> to vector<8x4xf32>
    %105 = arith.mulf %103, %104 : vector<8x4xf32>
    %c0_55 = arith.constant 0 : index
    %c0_56 = arith.constant 0 : index
    %c0_57 = arith.constant 0 : index
    %106 = vector.load %arg9[%c0_55, %c0_56, %c0_57] : memref<1x8x512xf32, #tpu.memory_space<vmem>>, vector<1x8x128xf32>
    %107 = vector.shape_cast %106 : vector<1x8x128xf32> to vector<8x128xf32>
    %108 = vector.extract_strided_slice %105 {offsets = [0, 0], sizes = [8, 1], strides = [1, 1]} : vector<8x4xf32> to vector<8x1xf32>
    %109 = vector.broadcast %108 : vector<8x1xf32> to vector<8x128xf32>
    %110 = arith.mulf %107, %109 : vector<8x128xf32>
    %c0_58 = arith.constant 0 : index
    %c0_59 = arith.constant 0 : index
    %c0_60 = arith.constant 0 : index
    %111 = vector.load %arg9[%c0_58, %c0_59, %c0_60] : memref<1x8x512xf32, #tpu.memory_space<vmem>>, vector<1x8x128xf32>
    %112 = vector.shape_cast %111 : vector<1x8x128xf32> to vector<8x128xf32>
    %113 = vector.shape_cast %110 : vector<8x128xf32> to vector<1x8x128xf32>
    tpu.vector_store %arg9[%c0_58, %c0_59, %c0_60], %113 {strides = array<i32>} : memref<1x8x512xf32, #tpu.memory_space<vmem>>, vector<1x8x128xf32>,
    %c0_61 = arith.constant 0 : index
    %c0_62 = arith.constant 0 : index
    %c128_63 = arith.constant 128 : index
    %114 = vector.load %arg9[%c0_61, %c0_62, %c128_63] : memref<1x8x512xf32, #tpu.memory_space<vmem>>, vector<1x8x128xf32>
    %115 = vector.shape_cast %114 : vector<1x8x128xf32> to vector<8x128xf32>
    %116 = vector.extract_strided_slice %105 {offsets = [0, 1], sizes = [8, 1], strides = [1, 1]} : vector<8x4xf32> to vector<8x1xf32>
    %117 = vector.broadcast %116 : vector<8x1xf32> to vector<8x128xf32>
    %118 = arith.mulf %115, %117 : vector<8x128xf32>
    %c0_64 = arith.constant 0 : index
    %c0_65 = arith.constant 0 : index
    %c128_66 = arith.constant 128 : index
    %119 = vector.load %arg9[%c0_64, %c0_65, %c128_66] : memref<1x8x512xf32, #tpu.memory_space<vmem>>, vector<1x8x128xf32>
    %120 = vector.shape_cast %119 : vector<1x8x128xf32> to vector<8x128xf32>
    %121 = vector.shape_cast %118 : vector<8x128xf32> to vector<1x8x128xf32>
    tpu.vector_store %arg9[%c0_64, %c0_65, %c128_66], %121 {strides = array<i32>} : memref<1x8x512xf32, #tpu.memory_space<vmem>>, vector<1x8x128xf32>,
    %c0_67 = arith.constant 0 : index
    %c0_68 = arith.constant 0 : index
    %c256_69 = arith.constant 256 : index
    %122 = vector.load %arg9[%c0_67, %c0_68, %c256_69] : memref<1x8x512xf32, #tpu.memory_space<vmem>>, vector<1x8x128xf32>
    %123 = vector.shape_cast %122 : vector<1x8x128xf32> to vector<8x128xf32>
    %124 = vector.extract_strided_slice %105 {offsets = [0, 2], sizes = [8, 1], strides = [1, 1]} : vector<8x4xf32> to vector<8x1xf32>
    %125 = vector.broadcast %124 : vector<8x1xf32> to vector<8x128xf32>
    %126 = arith.mulf %123, %125 : vector<8x128xf32>
    %c0_70 = arith.constant 0 : index
    %c0_71 = arith.constant 0 : index
    %c256_72 = arith.constant 256 : index
    %127 = vector.load %arg9[%c0_70, %c0_71, %c256_72] : memref<1x8x512xf32, #tpu.memory_space<vmem>>, vector<1x8x128xf32>
    %128 = vector.shape_cast %127 : vector<1x8x128xf32> to vector<8x128xf32>
    %129 = vector.shape_cast %126 : vector<8x128xf32> to vector<1x8x128xf32>
    tpu.vector_store %arg9[%c0_70, %c0_71, %c256_72], %129 {strides = array<i32>} : memref<1x8x512xf32, #tpu.memory_space<vmem>>, vector<1x8x128xf32>,
    %c0_73 = arith.constant 0 : index
    %c0_74 = arith.constant 0 : index
    %c384_75 = arith.constant 384 : index
    %130 = vector.load %arg9[%c0_73, %c0_74, %c384_75] : memref<1x8x512xf32, #tpu.memory_space<vmem>>, vector<1x8x128xf32>
    %131 = vector.shape_cast %130 : vector<1x8x128xf32> to vector<8x128xf32>
    %132 = vector.extract_strided_slice %105 {offsets = [0, 3], sizes = [8, 1], strides = [1, 1]} : vector<8x4xf32> to vector<8x1xf32>
    %133 = vector.broadcast %132 : vector<8x1xf32> to vector<8x128xf32>
    %134 = arith.mulf %131, %133 : vector<8x128xf32>
    %c0_76 = arith.constant 0 : index
    %c0_77 = arith.constant 0 : index
    %c384_78 = arith.constant 384 : index
    %135 = vector.load %arg9[%c0_76, %c0_77, %c384_78] : memref<1x8x512xf32, #tpu.memory_space<vmem>>, vector<1x8x128xf32>
    %136 = vector.shape_cast %135 : vector<1x8x128xf32> to vector<8x128xf32>
    %137 = vector.shape_cast %134 : vector<8x128xf32> to vector<1x8x128xf32>
    tpu.vector_store %arg9[%c0_76, %c0_77, %c384_78], %137 {strides = array<i32>} : memref<1x8x512xf32, #tpu.memory_space<vmem>>, vector<1x8x128xf32>,
    return
  }
  func.func @transform_0(%arg0: i32, %arg1: i32) -> (i32, i32, i32) {
    %c0_i32 = arith.constant 0 : i32
    %c0_i32_0 = arith.constant 0 : i32
    return %arg0, %arg1, %c0_i32 : i32, i32, i32
  }
  func.func @transform_1(%arg0: i32, %arg1: i32) -> (i32, i32, i32) {
    %c0_i32 = arith.constant 0 : i32
    %c0_i32_0 = arith.constant 0 : i32
    %c0_i32_1 = arith.constant 0 : i32
    return %arg0, %c0_i32, %c0_i32_0 : i32, i32, i32
  }
  func.func @transform_2(%arg0: i32, %arg1: i32) -> (i32, i32) {
    %c0_i32 = arith.constant 0 : i32
    %c0_i32_0 = arith.constant 0 : i32
    %c0_i32_1 = arith.constant 0 : i32
    return %c0_i32, %c0_i32_0 : i32, i32
  }
  func.func @transform_3(%arg0: i32, %arg1: i32) -> (i32, i32) {
    %c0_i32 = arith.constant 0 : i32
    %c0_i32_0 = arith.constant 0 : i32
    %c0_i32_1 = arith.constant 0 : i32
    return %c0_i32, %c0_i32_0 : i32, i32
  }
  func.func @transform_4(%arg0: i32, %arg1: i32) -> (i32, i32) {
    %c0_i32 = arith.constant 0 : i32
    %c0_i32_0 = arith.constant 0 : i32
    %c0_i32_1 = arith.constant 0 : i32
    return %c0_i32, %c0_i32_0 : i32, i32
  }
  func.func @transform_5(%arg0: i32, %arg1: i32) -> (i32, i32) {
    %c0_i32 = arith.constant 0 : i32
    %c0_i32_0 = arith.constant 0 : i32
    %c0_i32_1 = arith.constant 0 : i32
    return %c0_i32, %c0_i32_0 : i32, i32
  }
  func.func @transform_6(%arg0: i32, %arg1: i32) -> (i32, i32, i32) {
    %c0_i32 = arith.constant 0 : i32
    %c0_i32_0 = arith.constant 0 : i32
    %c0_i32_1 = arith.constant 0 : i32
    return %arg0, %c0_i32, %c0_i32_0 : i32, i32, i32
  }
  func.func @transform_7(%arg0: i32, %arg1: i32) -> (i32, i32, i32) {
    %c0_i32 = arith.constant 0 : i32
    %c0_i32_0 = arith.constant 0 : i32
    return %arg0, %arg1, %c0_i32 : i32, i32, i32
  }
}

</mosaic_0001>

<bundles_post_ra>
// kernel: tpu_custom_call.1
= control target key start
LH: loop header
LB: loop body
LE: loop exit
PB: predicated region body
PF: predicated region fallthrough
CT: control target
= control target key end

     0   :  { %s1953_s0 = inlined_call_operand.hbm [shape: f32[2,8,32], index: 0, kind: input, shape index: {}]   ;;  %s1954_s1 = inlined_call_operand.hbm [shape: f32[2,32,128], index: 1, kind: input, shape index: {}]   ;;  %s1955_s2 = inlined_call_operand.vmem [shape: f32[32,32], index: 2, kind: input, shape index: {}]   ;;  %s1956_s3 = inlined_call_operand.vmem [shape: f32[1,32], index: 3, kind: input, shape index: {}]   ;;  %s1957_s4 = inlined_call_operand.hbm [shape: f32[32,32], index: 4, kind: input, shape index: {}]   ;;  %s1958_s5 = inlined_call_operand.vmem [shape: f32[32,1], index: 5, kind: input, shape index: {}]   ;;  %s1959_s6 = inlined_call_operand.vmem [shape: f32[2,1,128], index: 6, kind: input, shape index: {}]   ;;  %s1960_s7 = inlined_call_operand.hbm [shape: f32[2,8,512], index: 7, kind: output, shape index: {}]  }
   0x1   :  { %1968 = sst [smem:[#allocation19_spill]] %s1953_s0 }
   0x2   :  { %1969 = sst [smem:[#allocation20_spill]] %s1957_s4 }
   0x3   :  { %12 = vsyncpa [#allocation6], 0 }
   0x4   :  { %14 = vsyncpa [#allocation6 + $0x1], 0 }
   0x5   :  { %15 = vsyncpa [#allocation9], 0 }
   0x6   :  { %17 = vsyncpa [#allocation9 + $0x1], 0 }
   0x7   :  { %18 = vsyncpa [#allocation7], 0 }
   0x8   :  { %20 = vsyncpa [#allocation7 + $0x1], 0  ;;  %s1620_s24 = smov 0   ;;  %s1622_s25 = smov 0  }
   0x9   :  { %s1624_s26 = smov 0   ;;  %s1626_s27 = smov 0  }
   0xa   :  { %s1628_s28 = smov 0   ;;  %s1630_s29 = smov 0  }
   0xb LB: > { %1970 = sst [smem:[#allocation16_spill]] %s1550_s26  ;;  %s1651_s30 = sadd.s32 4294967295, %s1562_s29   ;;  %s1562_s29 = sphi %s1630_s29, %s26_s29   ;;  %s1558_s28 = sphi %s1628_s28, %s1998_s28   ;;  %s1554_s27 = sphi %s1626_s27, %s1997_s27   ;;  %s1550_s26 = sphi %s1624_s26, %s1993_s26   ;;  %s1546_s25 = sphi %s1622_s25, %s1996_s25   ;;  %s1542_s24 = sphi %s1620_s24, %s1995_s24  }
   0xc   : > { %s1157_s8 = sadd.s32 4294967294, %s1562_s29   ;;  %p60_p0 = scmp.ne.s32.totalorder %s1546_s25, %s1542_s24 }
   0xd   : > { %p1961_p1 = scmp.eq.s32.totalorder %s1651_s30, 0  ;;  %p228_p3 = scmp.eq.s32.totalorder %s1157_s8, 1 }
   0xe   : > { %p1158_p5 = scmp.ge.s32.totalorder %s1562_s29, 1  ;;  %p235_p7 = scmp.lt.s32.totalorder %s1562_s29, 3 }
   0xf   : > { %p1660_p4 = por %p1961_p1, %p60_p0  ;;  %p1665_p6 = por %p228_p3, %p60_p0 }
  0x10   : > { %p1670_p8 = pnand %p1158_p5, %p235_p7  ;;  %s1564_s12 = smov [#allocation10]  }
  0x11   : > { %s1971_s9 = scalar_select %p1660_p4, 1, 0 }
  0x12   : > { %s1972_s10 = scalar_select %p1665_p6, 1, 0 }
  0x13   : > { %s1973_s11 = scalar_select %p1670_p8, 1, 0 }
  0x14   : > { %s253_s13 = sshll.u32 %s1564_s12, 4  ;;  %p1279_p9 = pneg %p1670_p8  ;;  %s254_s13 = int_to_ptr.vmem [resolvable:$true] %s253_s13 }
  0x15   : > { %s38_s15 = sadd.s32 1, %s1558_s28  ;;  %s1975_s4 = sld [smem:[#allocation20_spill]] }
  0x16   : > { %p1679_p11 = pnand %p1279_p9, %p1961_p1 }
  0x18   : > { %p1386_p13 = pneg %p1679_p11 }
  0x1b   : > { %s1384_s18 = scalar_lea.hbm %s1975_s4, 512 }
  0x1c   : > { %p1385_p12 = scmp.ne.s32.totalorder %s1975_s4, %s1384_s18  ;;  %p1391_p5 = scmp.lt.u32.totalorder %s1384_s18, %s1975_s4 }
  0x1e   : > { %p1387_p0 = pnand %p1386_p13, %p1385_p12 }
  0x20   : > { %p1388_p3 = pneg %p1387_p0 }
  0x22   : > { %p1393_p7 = pnand %p1391_p5, %p1388_p3 }
  0x24   : > { %1396 = shalt.err (!%p1393_p7)
}
  0x25   : > { %s1397_s23 = scalar_lea.vmem %s254_s13, 512  ;;  %p1405_p2 = scmp.lt.s32.totalorder %s254_s13, %s254_s13 }
  0x26   : > { %p1398_p9 = scmp.ne.s32.totalorder %s254_s13, %s1397_s23  ;;  %p1406_p6 = scmp.lt.s32.totalorder %s1397_s23, %s1397_s23 }
  0x28   : > { %p1400_p10 = pnand %p1398_p9, %p1386_p13  ;;  %p1407_p4 = por %p1406_p6, %p1405_p2 }
  0x2a   : > { %p1401_p1 = pneg %p1400_p10 }
  0x2c   : > { %p1408_p8 = pnand %p1407_p4, %p1401_p1 }
  0x2e   : > { %1411 = shalt.err (!%p1408_p8)
}
  0x2f   : > { %s1964_s8 = smov 128   ;;  %s1965_s12 = smov 8  }
  0x30   : > { %1282 = dma.hbm_to_vmem [thread:$0]  (!%p1679_p11), %s1975_s4, 512, %s254_s13, [#allocation9], %s1964_s8, %s1964_s8, %s1965_s12  }
  0x31   : > { %p40_p1 = scmp.ge.s32.totalorder %s38_s15, 2  ;;  %s47_s18 = sadd.s32 1, %s1550_s26 }
  0x32   : > { %p54_p2 = scmp.ne.s32.totalorder %s1550_s26, %s1546_s25  ;;  %p55_p4 = scmp.eq.s32.totalorder %s1562_s29, 0 }
  0x33   : > { %s2000_s15 = smov (%p40_p1, %s38_s15), 0  ;;  %p1978_p8 = scmp.eq.s32.totalorder %s1651_s30, 1 }
  0x34   : > { %1976 = sst [smem:[#allocation17_spill]] %s2000_s15  ;;  %p1709_p6 = por %p55_p4, %p54_p2 }
  0x35   : > { %p1715_p10 = por %p1978_p8, %p54_p2  ;;  %s42_s20 = ssub.s32 %s1558_s28, %s2000_s15 }
  0x36   : > { %p1295_p11 = scmp.lt.s32.totalorder %s1562_s29, 2  ;;  %p45_p12 = scmp.eq.s32.totalorder %s42_s20, 0 }
  0x37   : > { %s1723_s13 = sand.u32 1, %s1550_s26   ;;  %s1162_s23 = sshll.u32 %s1558_s28, 7 }
  0x38   : > { %s1161_s21 = sshll.u32 %s1723_s13, 3  ;;  %s1981_s0 = sld [smem:[#allocation19_spill]] }
  0x39   : > { %s1727_s22 = scalar_select %p45_p12, %s1550_s26, %s47_s18  }
  0x3a   : > { %s274_s12 = scalar_lea.vmem [#allocation5], %s1161_s21  ;;  %p1739_p13 = pnand %p1295_p11, %p1709_p6 }
  0x3b   : > { %1980 = sst [smem:[#allocation18_spill]] %s1727_s22  ;;  %s282_s20 = sshll.u32 %s274_s12, 4  ;;  %s1735_s20 = int_to_ptr.vmem [resolvable:$true] %s282_s20 }
  0x3c   : > { %s1163_s18 = sshll.u32 %s1723_s13, 5  ;;  %s271_s16 = scalar_lea.sflag [#allocation6], %s1723_s13 }
  0x3d   : > { %p1414_p3 = pneg %p1739_p13 }
  0x3e   : > { %s1733_s8 = scalar_lea.hbm %s1981_s0, %s1162_s23  ;;  %s1417_s19 = scalar_lea.hbm %s1981_s0, 256 }
  0x3f   : > { %s1412_s23 = scalar_lea.hbm %s1733_s8, 128  ;;  %p1418_p9 = scmp.lt.u32.totalorder %s1733_s8, %s1981_s0 }
  0x40   : > { %p1413_p0 = scmp.ne.s32.totalorder %s1733_s8, %s1412_s23  ;;  %p1419_p1 = scmp.lt.u32.totalorder %s1417_s19, %s1412_s23 }
  0x41   : > { %p1421_p4 = scmp.lt.u32.totalorder %s1412_s23, %s1733_s8 }
  0x42   : > { %p1415_p5 = pnand %p1414_p3, %p1413_p0  ;;  %p1420_p2 = por %p1419_p1, %p1418_p9 }
  0x44   : > { %p1416_p7 = pneg %p1415_p5  ;;  %p1422_p6 = por %p1421_p4, %p1420_p2 }
  0x46   : > { %p1423_p8 = pnand %p1422_p6, %p1416_p7 }
  0x48   : > { %1426 = shalt.err (!%p1423_p8)
}
  0x49   : > { %s1427_s15 = scalar_lea.vmem %s1735_s20, 128  ;;  %s1567_s12 = smov [#allocation5]  }
  0x4a   : > { %p1428_p11 = scmp.ne.s32.totalorder %s1735_s20, %s1427_s15  ;;  %s1432_s21 = sshll.u32 %s1567_s12, 4  ;;  %s1433_s21 = int_to_ptr.vmem [resolvable:$false] %s1432_s21 }
  0x4b   : > { %s1434_s22 = scalar_lea.vmem %s1433_s21, 256  ;;  %p1435_p5 = scmp.lt.s32.totalorder %s1735_s20, %s1433_s21 }
  0x4c   : > { %p1430_p12 = pnand %p1428_p11, %p1414_p3  ;;  %p1436_p9 = scmp.lt.s32.totalorder %s1434_s22, %s1427_s15 }
  0x4e   : > { %p1431_p0 = pneg %p1430_p12  ;;  %p1437_p1 = por %p1436_p9, %p1435_p5 }
  0x50   : > { %p1438_p2 = pnand %p1437_p1, %p1431_p0 }
  0x52   : > { %1441 = shalt.err (!%p1438_p2)
}
  0x53   : > { %1286 = dma.hbm_to_vmem [thread:$0]  (!%p1739_p13), %s1733_s8, 128, %s1735_s20, %s271_s16  }
  0x54   : > { %s293_s23 = scalar_lea.vmem [#allocation8], %s1163_s18  ;;  %s289_s17 = sand.u32 1, %s1562_s29  }
  0x55   : > { %s300_s19 = sshll.u32 %s293_s23, 4  ;;  %s1983_s12 = sshll.u32 %s1558_s28, 9  ;;  %s1774_s19 = int_to_ptr.vmem [resolvable:$true] %s300_s19 }
  0x56   : > { %s1781_s22 = scalar_lea.hbm %s1954_s1, %s1983_s12  ;;  %s1783_s0 = scalar_lea.sflag [#allocation9], %s289_s17 }
  0x57   : > { %s1442_s26 = scalar_lea.hbm %s1781_s22, 512  ;;  %s1447_s20 = scalar_lea.hbm %s1954_s1, 1024 }
  0x58   : > { %p1443_p7 = scmp.ne.s32.totalorder %s1781_s22, %s1442_s26  ;;  %p1448_p8 = scmp.lt.u32.totalorder %s1781_s22, %s1954_s1 }
  0x59   : > { %p1449_p11 = scmp.lt.u32.totalorder %s1447_s20, %s1442_s26  ;;  %p1451_p0 = scmp.lt.u32.totalorder %s1442_s26, %s1781_s22 }
  0x5a   : > { %p1445_p4 = pnand %p1443_p7, %p1414_p3 }
  0x5b   : > { %p1450_p12 = por %p1449_p11, %p1448_p8 }
  0x5c   : > { %p1446_p6 = pneg %p1445_p4 }
  0x5d   : > { %p1452_p5 = por %p1451_p0, %p1450_p12 }
  0x5f   : > { %p1453_p9 = pnand %p1452_p5, %p1446_p6 }
  0x61   : > { %1456 = shalt.err (!%p1453_p9)
}
  0x62   : > { %s1457_s23 = scalar_lea.vmem %s1774_s19, 512  ;;  %s1568_s17 = smov [#allocation8]  }
  0x63   : > { %p1458_p1 = scmp.ne.s32.totalorder %s1774_s19, %s1457_s23  ;;  %s1462_s12 = sshll.u32 %s1568_s17, 4  ;;  %s1463_s12 = int_to_ptr.vmem [resolvable:$false] %s1462_s12 }
  0x64   : > { %s1464_s15 = scalar_lea.vmem %s1463_s12, 1024  ;;  %p1465_p4 = scmp.lt.s32.totalorder %s1774_s19, %s1463_s12 }
  0x65   : > { %p1460_p2 = pnand %p1458_p1, %p1414_p3  ;;  %p1466_p8 = scmp.lt.s32.totalorder %s1464_s15, %s1457_s23 }
  0x67   : > { %p1461_p7 = pneg %p1460_p2  ;;  %p1467_p11 = por %p1466_p8, %p1465_p4 }
  0x69   : > { %p1468_p12 = pnand %p1467_p11, %p1461_p7 }
  0x6b   : > { %1471 = shalt.err (!%p1468_p12)
}
  0x6c   : > { %s1984_s26 = smov 8   ;;  %s1985_s21 = smov 128  }
  0x6d   : > { %1289 = dma.hbm_to_vmem [thread:$0]  (!%p1739_p13), %s1781_s22, 512, %s1774_s19, %s1783_s0, %s1985_s21, %s1985_s21, %s1984_s26  }
  0x6e   : > { %p1986_p3 = scmp.ne.s32.totalorder %s1973_s11, 0 }
  0x6f   : > { %s1815_s8 = sand.u32 (!%p1986_p3), 1, %s1546_s25   ;;  %p1987_p6 = scmp.ne.s32.totalorder (!%p1986_p3), %s1971_s9, 0 }
  0x70   : > { %318 = sbr.rel (%p1986_p3) target bundleno = 1160 (0x488), region = 48  ;;  %s1167_s13 = sshll.u32 (!%p1986_p3), %s1815_s8, 3 }
  0x71   : > { %s321_s20 = scalar_lea.sflag (!%p1986_p3), [#allocation6], %s1815_s8  ;;  %s1819_s18 = scalar_lea.vmem (!%p1986_p3), [#allocation5], %s1167_s13 }
  0x77   : > { %1525 = dma.done.wait (%p1987_p6), %s321_s20, 128  }
  0x78   : > { %1527 = vsyncadd (%p1987_p6), %s321_s20, 4294967168  ;;  %s329_s0 = sand.u32 1, %s1651_s30   ;;  %s1168_s4 = sshll.u32 %s1815_s8, 5 }
  0x79   : > { %s330_s11 = scalar_lea.sflag [#allocation9], %s329_s0  ;;  %s333_s19 = scalar_lea.vmem [#allocation8], %s1168_s4 }
  0x7a   : > { %1529 = dma.done.wait (%p1987_p6), %s330_s11, 512  }
  0x7b   : > { %1531 = vsyncadd (%p1987_p6), %s330_s11, 4294966784  ;;  %p1988_p13 = scmp.eq.s32.totalorder %s1651_s30, 0 }
  0x7d   : > { %1533 = dma.done.wait (%p1988_p13), [#allocation9], 512   ;;  %p1989_p0 = pmov %p1988_p13 }
  0x7e   : > { %v1569_v0 = vmov 0.0|0.0   ;;  %vm1570_vm0 = vmmov 0   ;;  %v1571_v1 = vmov 0.0   ;;  %v1572_v2 = vmov 0   ;;  %v518_v3 = vld [vmem:[%s1955_s2] sm:$0xff]  ;;  %v519_v4 = vld [vmem:[%s1955_s2 + $0x8] sm:$0xff] }
  0x7f   : > { %1535 = vsyncadd (%p1989_p0), [#allocation9], 4294966784  ;;  %1263 = vmatprep.subr.bf16.mxu1 %v1569_v0  ;;  %1232 = vmatprep.mubr.msk.f32.mxu1 %vm1570_vm0, %v1571_v1  ;;  %v520_v5 = vld [vmem:[%s1955_s2 + $0x10] sm:$0xff]  ;;  %v1264_v6 = vpack.c.bf16 %v519_v4, %v518_v3  ;;  %v521_v7 = vld [vmem:[%s1955_s2 + $0x18] sm:$0xff]  ;;  %vm415_vm1 = vcmask 261120   ;;  %vm613_vm2 = vcmask 64512  }
  0x80   : > { %1359 = vset.pattern.permute.xlu0 %v1572_v2  ;;  %1360 = vset.pattern.permute.xlu1 %v1572_v2  ;;  %v387_v8 = vld [vmem:[%s333_s19] sm:$0xff]  ;;  %v388_v9 = vld [vmem:[%s333_s19 + $0x8] sm:$0xff]  ;;  %v389_v11 = vld [vmem:[%s333_s19 + $0x10] sm:$0xff]  ;;  %v1267_v13 = vpack.c.bf16 %v521_v7, %v520_v5  ;;  %s1573_s9 = smov 112   ;;  %s1574_s23 = smov 120   ;;  %vm699_vm3 = vcmask 7168  }
  0x81   : > { %v1255_v10 = vpack.c.bf16 %v388_v9, %v387_v8  ;;  %v390_v12 = vld [vmem:[%s333_s19 + $0x18] sm:$0xff]  ;;  %1265 = vmatpush3.bf16.msra.mxu1 %v1264_v6  ;;  %v383_v15 = vld [vmem:[#allocation10] sm:$0xff]  ;;  %v393_v17 = vld [vmem:[%s1958_s5 + $0x10] sm:$0xff]  ;;  %s1575_s30 = smov 104   ;;  %p376_p5 = scmp.lt.s32.totalorder %s1554_s27, 1  ;;  %vm792_vm4 = vcmask 15368  }
  0x82   : > { %v1259_v14 = vpack.c.bf16 %v390_v12, %v389_v11  ;;  %v391_v16 = vld [vmem:[%s1958_s5] sm:$0xff]  ;;  %1266 = vmatprep.subr.bf16.mxu1 %v1569_v0  ;;  %1218 = vmatprep.mubr.msk.f32.mxu0 %vm415_vm1, %v383_v15  ;;  %v517_v18 = vld [vmem:[%s1819_s18] sm:$0xff]  ;;  %v392_v19 = vld [vmem:[%s1958_s5 + $0x8] sm:$0xff]  ;;  %vm885_vm5 = vcmask 23568   ;;  %vm978_vm6 = vcmask 31768   ;;  %s375_s21 = scalar_lea.vmem [#allocation11], %s1168_s4 }
  0x83   : > { %1256 = vmatprep.subr.bf16.mxu0 %v1255_v10  ;;  %397 = vperm.xlu0 %1359, %v391_v16   ;;  %v394_v20 = vld [vmem:[%s1958_s5 + $0x18] sm:$0xff]  ;;  %v384_v21 = vld [vmem:[#allocation10 + $0x8] sm:$0xff]  ;;  %v385_v22 = vld [vmem:[#allocation10 + $0x10] sm:$0xff]  ;;  %s377_s17 = scalar_select %p376_p5, %s1554_s27, 1 }
  0x84   : > { %1258 = vmatpush3.bf16.msra.mxu0 %v1255_v10  ;;  %407 = vperm.xlu1 %1360, %v393_v17   ;;  %v386_v23 = vld [vmem:[#allocation10 + $0x18] sm:$0xff]  ;;  %v1175_v25 = vld [vmem:[%s1956_s3] ss:$0 sm:$0xff]  ;;  %s1188_s13 = sshll.u32 %s1554_s27, 9  ;;  %s1033_s20 = sshll.u32 %s375_s21, 4  ;;  %s1906_s20 = int_to_ptr.vmem [resolvable:$true] %s1033_s20 }
  0x85   : > { %1260 = vmatprep.subr.bf16.mxu0 %v1259_v14  ;;  %1268 = vmatpush3.bf16.msra.mxu1 %v1267_v13  ;;  %s378_s26 = scalar_lea.vmem %s1959_s6, %s377_s17  ;;  %s1904_s19 = scalar_lea.hbm %s1960_s7, %s1188_s13 }
  0x86   : > { %1235 = vmatprep.subr.mxu1 %v1571_v1  ;;  %v1177_v44 = vld [vmem:[%s378_s26] ss:$0 sm:$0xff]  ;;  %s1017_s4 = scalar_lea.sflag [#allocation7], %s1815_s8  ;;  %s1472_s22 = scalar_lea.vmem %s1906_s20, 512 }
  0x87   : > { %402 = vperm.xlu0 %1359, %v392_v19   ;;  %p1473_p9 = scmp.ne.s32.totalorder %s1906_s20, %s1472_s22  ;;  %s1579_s27 = smov [#allocation11]  }
  0x88   : > { %1262 = vmatpush3.bf16.msra.mxu0 %v1259_v14  ;;  %1233 = vmatmul.mubr.msk.f32.vlgmr.msra.gmra.mrb[0].mxu1 %vm415_vm1, %v517_v18  ;;  %v1576_v14 = vmov 1   ;;  %s1476_s18 = sshll.u32 %s1579_s27, 4  ;;  %s1477_s18 = int_to_ptr.vmem [resolvable:$false] %s1476_s18 }
  0x89   : > { %412 = vperm.xlu1 %1360, %v394_v20   ;;  %1237 = vmatprep.mubr.msk.f32.mxu1 %vm1570_vm0, %v1571_v1  ;;  %p1474_p1 = pnand %p1473_p9, %p1715_p10  ;;  %s1478_s16 = scalar_lea.vmem %s1477_s18, 1024 }
  0x8a   : > { %1240 = vmatprep.subr.mxu0 %v1571_v1  ;;  %p1479_p7 = scmp.lt.s32.totalorder %s1906_s20, %s1477_s18  ;;  %p1480_p4 = scmp.lt.s32.totalorder %s1478_s16, %s1472_s22 }
  0x8b   : > { %1219 = vmatmul.mubr.msk.f32.vlgmr.msra.gmra.mrb[0].mxu0 %vm415_vm1, %v384_v21  ;;  %p1475_p2 = pneg %p1474_p1 }
  0x8c   : > { %1221 = vmatprep.mubr.msk.f32.mxu0 %vm415_vm1, %v385_v22  ;;  %p1481_p8 = por %p1480_p4, %p1479_p7 }
  0x8d   : > { %1361 = vset.pattern.permute.xlu1 %v1576_v14 }
  0x8e   : > { %p1482_p11 = pnand %p1481_p8, %p1475_p2 }
  0x8f   : > { %1222 = vmatmul.mubr.msk.f32.gmra.mrb[2].mxu0 %vm415_vm1, %v386_v23 }
  0x90   : > { %1242 = vmatprep.mubr.msk.f32.mxu0 %vm1570_vm0, %v1571_v1 }
 0x102   : > { %v398_v24 = vpop.permute.xlu0 %397 }
 0x103   : > { %v408_v36 = vpop.permute.xlu1 %407 }
 0x106   : > { %v403_v27 = vpop.permute.xlu0 %402 }
 0x108   : > { %v413_v39 = vpop.permute.xlu1 %412 }
 0x15b   : > { %v599_v26 = vpop.f32.mrb[0].mxu1 }
 0x15c   : > { %v600_v28 = vadd.f32 %v1175_v25, %v599_v26  ;;  %v1234_v29 = vpop.f32.mrb[1].mxu1 }
 0x15e   : > { %v1220_v30 = vpop.f32.mrb[0].mxu0  ;;  %603 = vst.msk [vmem:[#allocation3] sm:$0xff] %vm415_vm1, %v600_v28 }
 0x15f   : > { %v494_v31 = vpop.f32.mrb[1].mxu0  ;;  %v500_v32 = vadd.f32 %v1220_v30, %v403_v27 }
 0x160   : > { %v495_v33 = vadd.f32 %v494_v31, %v398_v24 }
 0x161   : > { %1241 = vmatpush3.msra.mxu0 %v500_v32 }
 0x162   : > { %1236 = vmatpush3.msra.mxu1 %v495_v33  ;;  %v1223_v34 = vpop.f32.mrb[2].mxu0  ;;  %1250 = vmatprep.subr.mxu0 %v1571_v1 }
 0x163   : > { %v504_v35 = vpop.f32.mrb[3].mxu0  ;;  %1245 = vmatprep.subr.mxu1 %v1571_v1  ;;  %v510_v40 = vadd.f32 %v1223_v34, %v413_v39 }
 0x164   : > { %v505_v37 = vadd.f32 %v504_v35, %v408_v36 }
 0x165   : > { %v795_v38 = vld [vmem:[#allocation3] sm:$0xff] }
 0x166   : > { %798 = vrot.lane.b32.xlu1 %v795_v38, %s1573_s9  ;;  %705 = vrot.lane.b32.xlu0 %v795_v38, %s1574_s23 }
 0x167   : > { %1238 = vmatmul.mubr.msk.f32.vlgmr.msra.gmra.mrb[2].mxu1 %vm613_vm2, %v795_v38 }
 0x168   : > { %1246 = vmatpush3.msra.mxu1 %v505_v37  ;;  %1247 = vmatprep.mubr.msk.f32.mxu1 %vm1570_vm0, %v1571_v1 }
 0x16a   : > { %891 = vrot.lane.b32.xlu0 %v795_v38, %s1575_s30 }
 0x1d8   : > { %v799_v41 = vpop.permute.xlu1 %798  ;;  %v706_v42 = vpop.permute.xlu0 %705 }
 0x1d9   : > { %1243 = vmatmul.mubr.msk.f32.vlgmr.msra.gmra.mrb[4].mxu0 %vm613_vm2, %v706_v42  ;;  %1248 = vmatmul.mubr.msk.f32.vlgmr.msra.gmra.mrb[4].mxu1 %vm613_vm2, %v799_v41 }
 0x1da   : > { %1251 = vmatpush3.msra.mxu0 %v510_v40  ;;  %1252 = vmatprep.mubr.msk.f32.mxu0 %vm1570_vm0, %v1571_v1 }
 0x1dc   : > { %v892_v43 = vpop.permute.xlu0 %891 }
 0x1dd   : > { %1253 = vmatmul.mubr.msk.f32.vlgmr.msra.gmra.mrb[6].mxu0 %vm613_vm2, %v892_v43  ;;  %v1577_v43 = vmov 2  }
 0x23a   : > { %v683_v45 = vpop.f32.mrb[2].mxu1 }
 0x23b   : > { %v684_v46 = vadd.f32 %v1177_v44, %v683_v45  ;;  %v1239_v47 = vpop.f32.mrb[3].mxu1 }
 0x23d   : > { %687 = vmax.xlane.f32.xlu1 %v684_v46 }
 0x2ac   : > { %v775_v48 = vpop.f32.mrb[4].mxu0  ;;  %v868_v49 = vpop.f32.mrb[4].mxu1 }
 0x2ad   : > { %v776_v50 = vadd.f32 %v1177_v44, %v775_v48  ;;  %v1244_v51 = vpop.f32.mrb[5].mxu0  ;;  %v1249_v52 = vpop.f32.mrb[5].mxu1  ;;  %v869_v54 = vadd.f32 %v1177_v44, %v868_v49 }
 0x2af   : > { %779 = vmax.xlane.f32.xlu0 %v776_v50 }
 0x2b0   : > { %v961_v53 = vpop.f32.mrb[6].mxu0 }
 0x2b1   : > { %v962_v55 = vadd.f32 %v1177_v44, %v961_v53  ;;  %v1254_v56 = vpop.f32.mrb[7].mxu0  ;;  %v1578_v44 = vmov 3  }
 0x2b3   : > { %965 = vmax.xlane.f32.xlu1 %v962_v55  ;;  %872 = vmax.xlane.f32.xlu0 %v869_v54 }
 0x2ca   : > { %v688_v57 = vpop.xlane.xlu1 %687 }
 0x2cb   : > { %v689_v58 = vsub.f32 %v684_v46, %v688_v57  ;;  %700 = vst.msk [vmem:[#allocation4] sm:$0xff] %vm699_vm3, %v688_v57  ;;  %v692_v15 = vsub.f32 -inf, %v688_v57 }
 0x2cd   : > { %v690_v59 = vmul.f32 1.442695, %v689_v58  ;;  %v693_v16 = vmul.f32 1.442695, %v692_v15 }
 0x2cf   : > { %1364 = vpow2.f32 %v690_v59 }
 0x2d9   : > { %v1894_v60 = vpop.eup %1364 }
 0x2da   : > { %696 = vadd.xlane.f32.xlu0 %v1894_v60 }
 0x33c   : > { %v780_v61 = vpop.xlane.xlu0 %779 }
 0x33d   : > { %v781_v62 = vmax.f32 %v688_v57, %v780_v61 }
 0x33f   : > { %793 = vst.msk [vmem:[#allocation4] sm:$0xff] %vm792_vm4, %v781_v62  ;;  %v782_v63 = vsub.f32 %v776_v50, %v781_v62  ;;  %v785_v17 = vsub.f32 %v688_v57, %v781_v62 }
 0x340   : > { %v873_v0 = vpop.xlane.xlu0 %872  ;;  %v966_v3 = vpop.xlane.xlu1 %965 }
 0x341   : > { %v874_v1 = vmax.f32 %v781_v62, %v873_v0  ;;  %v783_v2 = vmul.f32 1.442695, %v782_v63  ;;  %v786_v18 = vmul.f32 1.442695, %v785_v17 }
 0x343   : > { %v878_v4 = vsub.f32 %v781_v62, %v874_v1  ;;  %886 = vst.msk [vmem:[#allocation4] sm:$0xff] %vm885_vm5, %v874_v1  ;;  %v967_v5 = vmax.f32 %v874_v1, %v966_v3  ;;  %1366 = vpow2.f32 %v783_v2  ;;  %v875_v6 = vsub.f32 %v869_v54, %v874_v1 }
 0x345   : > { %v971_v7 = vsub.f32 %v874_v1, %v967_v5  ;;  %979 = vst.msk [vmem:[#allocation4] sm:$0xff] %vm978_vm6, %v967_v5  ;;  %v876_v8 = vmul.f32 1.442695, %v875_v6  ;;  %v968_v9 = vsub.f32 %v962_v55, %v967_v5  ;;  %v879_v19 = vmul.f32 1.442695, %v878_v4 }
 0x347   : > { %1368 = vpow2.f32 %v876_v8  ;;  %v969_v10 = vmul.f32 1.442695, %v968_v9  ;;  %v972_v21 = vmul.f32 1.442695, %v971_v7 }
 0x349   : > { %1370 = vpow2.f32 %v969_v10 }
 0x34a   : > { %1372 = vpow2.f32 %v693_v16 }
 0x34b   : > { %1374 = vpow2.f32 %v786_v18 }
 0x34c   : > { %1376 = vpow2.f32 %v879_v19  ;;  %v982_v27 = vld [vmem:[#allocation4] sm:$0xff] }
 0x34d   : > { %v1367_v11 = vpop.eup %1366  ;;  %1378 = vpow2.f32 %v972_v21  ;;  %v983_v31 = vsub.f32 %v982_v27, %v967_v5 }
 0x34e   : > { %789 = vadd.xlane.f32.xlu1 %v1367_v11 }
 0x34f   : > { %v984_v36 = vmul.f32 1.442695, %v983_v31 }
 0x351   : > { %v1369_v12 = vpop.eup %1368  ;;  %1380 = vpow2.f32 %v984_v36 }
 0x352   : > { %882 = vadd.xlane.f32.xlu0 %v1369_v12 }
 0x353   : > { %v1371_v13 = vpop.eup %1370 }
 0x354   : > { %975 = vadd.xlane.f32.xlu1 %v1371_v13  ;;  %v1373_v20 = vpop.eup %1372 }
 0x355   : > { %v695_v23 = vmul.f32 0.0, %v1373_v20  ;;  %v1375_v25 = vpop.eup %1374 }
 0x356   : > { %v1377_v30 = vpop.eup %1376 }
 0x357   : > { %v1379_v35 = vpop.eup %1378 }
 0x35b   : > { %v1381_v40 = vpop.eup %1380 }
 0x367   : > { %v697_v22 = vpop.xlane.xlu0 %696 }
 0x368   : > { %v698_v24 = vadd.f32 %v697_v22, %v695_v23 }
 0x36a   : > { %v788_v26 = vmul.f32 %v1375_v25, %v698_v24 }
 0x3db   : > { %v790_v28 = vpop.xlane.xlu1 %789 }
 0x3dc   : > { %v791_v29 = vadd.f32 %v790_v28, %v788_v26 }
 0x3de   : > { %v881_v32 = vmul.f32 %v1377_v30, %v791_v29 }
 0x3df   : > { %v883_v33 = vpop.xlane.xlu0 %882 }
 0x3e0   : > { %v884_v34 = vadd.f32 %v883_v33, %v881_v32 }
 0x3e1   : > { %v976_v38 = vpop.xlane.xlu1 %975 }
 0x3e2   : > { %v974_v37 = vmul.f32 %v1379_v35, %v884_v34 }
 0x3e4   : > { %v977_v39 = vadd.f32 %v976_v38, %v974_v37 }
 0x3e6   : > { %1382 = vrcp.f32 %v977_v39 }
 0x3f0   : > { %v1383_v41 = vpop.eup %1382 }
 0x3f1   : > { %v986_v42 = vmul.f32 %v1383_v41, %v1381_v40 }
 0x3f3   : > { %997 = vperm.xlu1 %1361, %v986_v42   ;;  %990 = vperm.xlu0 %1359, %v986_v42  }
 0x3f7   : > { %1362 = vset.pattern.permute.xlu1 %v1577_v43  ;;  %1363 = vset.pattern.permute.xlu0 %v1578_v44 }
 0x3f8   : > { %1004 = vperm.xlu1 %1362, %v986_v42   ;;  %1011 = vperm.xlu0 %1363, %v986_v42  }
 0x472   : > { %v998_v45 = vpop.permute.xlu1 %997  ;;  %v991_v46 = vpop.permute.xlu0 %990 }
 0x473   : > { %v1000_v47 = vmul.f32 %v1367_v11, %v998_v45  ;;  %v993_v48 = vmul.f32 %v1894_v60, %v991_v46 }
 0x475   : > { %1001 = vst [vmem:[%s375_s21 + $0x8] sm:$0xff] %v1000_v47  ;;  %994 = vst [vmem:[%s375_s21] sm:$0xff] %v993_v48 }
 0x477   : > { %v1005_v49 = vpop.permute.xlu1 %1004  ;;  %v1012_v50 = vpop.permute.xlu0 %1011 }
 0x478   : > { %v1007_v51 = vmul.f32 %v1369_v12, %v1005_v49  ;;  %v1014_v52 = vmul.f32 %v1371_v13, %v1012_v50 }
 0x47a   : > { %1008 = vst [vmem:[%s375_s21 + $0x10] sm:$0xff] %v1007_v51  ;;  %1015 = vst [vmem:[%s375_s21 + $0x18] sm:$0xff] %v1014_v52 }
 0x47b   : > { %1485 = shalt.err (!%p1482_p11)
}
 0x47c   : > { %s1486_s8 = scalar_lea.hbm %s1904_s19, 512  ;;  %s1490_s30 = scalar_lea.hbm %s1960_s7, 1024 }
 0x47d   : > { %p1487_p12 = scmp.ne.s32.totalorder %s1904_s19, %s1486_s8  ;;  %p1491_p13 = scmp.lt.u32.totalorder %s1904_s19, %s1960_s7 }
 0x47e   : > { %p1492_p0 = scmp.lt.u32.totalorder %s1490_s30, %s1486_s8  ;;  %p1494_p9 = scmp.lt.u32.totalorder %s1486_s8, %s1904_s19 }
 0x47f   : > { %p1488_p3 = pnand %p1487_p12, %p1715_p10 }
 0x480   : > { %p1493_p5 = por %p1492_p0, %p1491_p13 }
 0x481   : > { %p1489_p6 = pneg %p1488_p3 }
 0x482   : > { %p1495_p1 = por %p1494_p9, %p1493_p5 }
 0x484   : > { %p1496_p2 = pnand %p1495_p1, %p1489_p6 }
 0x486   : > { %1499 = shalt.err (!%p1496_p2)
}
 0x487   : > { %1277 = dma.vmem_to_hbm [thread:$0]  (%p1715_p10), %s1906_s20, 512, %s1904_s19, %s1017_s4  }
 0x488 PF: > { %s1045_s15 = sand.u32 1, %s1542_s24   ;;  %p1990_p7 = scmp.ne.s32.totalorder %s1972_s10, 0 }
 0x489   : > { %p1991_p4 = scmp.ge.s32.totalorder %s1562_s29, 2  ;;  %s1046_s26 = scalar_lea.sflag [#allocation7], %s1045_s15 }
 0x48b   : > { %p1291_p8 = pnand %p1991_p4, %p1990_p7 }
 0x48d   : > { %1537 = dma.done.wait (!%p1291_p8), %s1046_s26, 512  }
 0x48e   : > { %1539 = vsyncadd (!%p1291_p8), %s1046_s26, 4294966784  ;;  %s26_s29 = sadd.s32 1, %s1562_s29   ;;  %s1992_s21 = sld [smem:[#allocation16_spill]] }
 0x48f   : > { %p23_p11 = scmp.ge.s32.totalorder %s26_s29, 4   ;;  %s1993_s26 = sld [smem:[#allocation18_spill]] }
 0x490   : > { %s1994_s14 = sld [smem:[#allocation17_spill]]  ;;  %s1995_s24 = smov %s1546_s25 }
 0x491   : > { %s1997_s27 = smov %s1558_s28  ;;  %25 = sbr.rel (!%p23_p11) target bundleno = 11 (0xb), region = 117 }
 0x494   : > { %s1996_s25 = smov %s1992_s21 }
 0x496   : > { %s1998_s28 = smov %s1994_s14 }
 0x498   :  { %1051 = vsyncpa [#allocation6], 1 }
 0x499   :  { %1053 = vsyncpa [#allocation6 + $0x1], 1 }
 0x49a   :  { %1054 = vsyncpa [#allocation9], 1 }
 0x49b   :  { %1056 = vsyncpa [#allocation9 + $0x1], 1 }
 0x49c   :  { %1057 = vsyncpa [#allocation7], 1 }
 0x49d   :  { %1059 = vsyncpa [#allocation7 + $0x1], 1 }

</bundles_post_ra>
